<compile_context>
chip_gen: v5e
topology: v5e:2x2
jax: 0.10.0
libtpu: 0.0.40
codegen_flags: <defaults>
</compile_context>

<pallas_src>
import functools

import jax
import jax.numpy as jnp
from jax.experimental import pallas as pl
from jax.experimental.pallas import tpu as pltpu


D_IN = 64        # d_in
D_HIDDEN = 128   # d_hidden
D_OUT = 69       # d_out = 23 * 3
J, C = 23, 3


def _round_up(x, m):
    return ((x + m - 1) // m) * m


def _cdiv(a, b):
    return (a + b - 1) // b


def mlp_kernel(z_ref, w1_ref, b1_ref, w2_ref, b2_ref, w3_ref, b3_ref,
               o_ref, h_ref):
    # z_ref : (tile, 64)   f32  latent codes
    # w1_ref: (64, 128)    bf16 fc1 weight (in, out);  b1_ref: (1, 128) f32
    # w2_ref: (128, 128)   bf16 fc2 weight (in, out);  b2_ref: (1, 128) f32
    # w3_ref: (128, 69)    bf16 fc3 weight (in, out);  b3_ref: (1, 69)  f32
    # o_ref : (tile, 69)   f32  output tile (last dim == full array dim)
    # h_ref : (tile, 128)  f32  VMEM scratch for hidden activations

    # fc1 + ReLU  (bf16 MXU operands, f32 accumulate, f32 elementwise)
    h = jnp.dot(z_ref[...].astype(jnp.bfloat16), w1_ref[...],
                preferred_element_type=jnp.float32)
    h_ref[...] = jnp.maximum(h + b1_ref[...], 0.0)

    # fc2 + ReLU
    h = jnp.dot(h_ref[...].astype(jnp.bfloat16), w2_ref[...],
                preferred_element_type=jnp.float32)
    h_ref[...] = jnp.maximum(h + b2_ref[...], 0.0)

    # fc3 (no activation), written straight to the 69-wide output tile
    out = jnp.dot(h_ref[...].astype(jnp.bfloat16), w3_ref[...],
                  preferred_element_type=jnp.float32)
    o_ref[...] = (out + b3_ref[...]).astype(o_ref.dtype)


def _choose_tile(B, row_tile):
    if B >= 2 * row_tile:
        return row_tile
    if B >= 256:
        # Ensure >= 2 grid steps so both v7x TensorCores get work.
        return _round_up(_cdiv(B, 2), 8)
    if B >= 8:
        # Largest multiple of 8 that does not exceed B (ragged tail if B%8).
        return (B // 8) * 8
    # Tiny batch: block dim == full array dim satisfies the tiling rule.
    return B


@functools.partial(jax.jit, static_argnames=("row_tile",))
def ending_motion_generator_forward(z, w1, b1, w2, b2, w3, b3, *, row_tile=1024):
    """z: (B, 64) f32 -> (B, 23, 3) f32."""
    B, d_in = z.shape
    assert d_in == D_IN, f"expected d_in == {D_IN}, got {d_in}"

    tile = _choose_tile(B, row_tile)
    grid = (_cdiv(B, tile),)

    # bf16 weights (tiny, grid-invariant blocks); biases stay f32.
    w1b = w1.astype(jnp.bfloat16)
    w2b = w2.astype(jnp.bfloat16)
    w3b = w3.astype(jnp.bfloat16)
    b1r = b1.astype(jnp.float32).reshape(1, D_HIDDEN)
    b2r = b2.astype(jnp.float32).reshape(1, D_HIDDEN)
    b3r = b3.astype(jnp.float32).reshape(1, D_OUT)

    flops = 2 * B * (D_IN * D_HIDDEN + D_HIDDEN * D_HIDDEN + D_HIDDEN * D_OUT)
    bytes_accessed = (
        4 * B * D_IN                       # z in (f32)
        + 4 * B * D_OUT                    # out (f32)
        + 2 * (D_IN * D_HIDDEN + D_HIDDEN * D_HIDDEN + D_HIDDEN * D_OUT)  # bf16 W
        + 4 * (2 * D_HIDDEN + D_OUT)       # biases (f32)
    )

    out = pl.pallas_call(
        mlp_kernel,
        out_shape=jax.ShapeDtypeStruct((B, D_OUT), jnp.float32),
        grid_spec=pltpu.PrefetchScalarGridSpec(
            num_scalar_prefetch=0,
            grid=grid,
            in_specs=[
                pl.BlockSpec((tile, D_IN), lambda i: (i, 0)),
                pl.BlockSpec((D_IN, D_HIDDEN), lambda i: (0, 0)),
                pl.BlockSpec((1, D_HIDDEN), lambda i: (0, 0)),
                pl.BlockSpec((D_HIDDEN, D_HIDDEN), lambda i: (0, 0)),
                pl.BlockSpec((1, D_HIDDEN), lambda i: (0, 0)),
                pl.BlockSpec((D_HIDDEN, D_OUT), lambda i: (0, 0)),
                pl.BlockSpec((1, D_OUT), lambda i: (0, 0)),
            ],
            out_specs=pl.BlockSpec((tile, D_OUT), lambda i: (i, 0)),
            scratch_shapes=[pltpu.VMEM((tile, D_HIDDEN), jnp.float32)],
        ),
        compiler_params=pltpu.CompilerParams(
            dimension_semantics=("parallel",),
        ),
        cost_estimate=pl.CostEstimate(
            flops=flops, transcendentals=0, bytes_accessed=bytes_accessed
        ),
    )(z, w1b, b1r, w2b, b2r, w3b, b3r)

    # Row-major (B, 69) -> (B, 23, 3) is a free reshape.
    return out.reshape(B, J, C)


def reference_forward(z, w1, b1, w2, b2, w3, b3):
    h = jnp.maximum(z @ w1 + b1, 0.0)
    h = jnp.maximum(h @ w2 + b2, 0.0)
    out = h @ w3 + b3
    return out.reshape(z.shape[0], J, C)


if __name__ == "__main__":
    key = jax.random.PRNGKey(0)
    k_z, k_w1, k_b1, k_w2, k_b2, k_w3, k_b3 = jax.random.split(key, 7)

    # Small shapes consistent with the module: B=16 latent codes of dim 64.
    B = 16
    z = jax.random.normal(k_z, (B, D_IN), dtype=jnp.float32)

    # Deterministic synthetic parameters (nn.Linear math, stored (in, out)).
    w1 = jax.random.normal(k_w1, (D_IN, D_HIDDEN), dtype=jnp.float32) * 0.05
    b1 = jax.random.normal(k_b1, (D_HIDDEN,), dtype=jnp.float32) * 0.01
    w2 = jax.random.normal(k_w2, (D_HIDDEN, D_HIDDEN), dtype=jnp.float32) * 0.05
    b2 = jax.random.normal(k_b2, (D_HIDDEN,), dtype=jnp.float32) * 0.01
    w3 = jax.random.normal(k_w3, (D_HIDDEN, D_OUT), dtype=jnp.float32) * 0.05
    b3 = jax.random.normal(k_b3, (D_OUT,), dtype=jnp.float32) * 0.01

    out = ending_motion_generator_forward(z, w1, b1, w2, b2, w3, b3)
    out = jax.block_until_ready(out)

    ref = reference_forward(z, w1, b1, w2, b2, w3, b3)
    assert out.shape == (B, J, C), out.shape
    # Tolerance loosened vs. the pure-f32 reference because MXU operands are
    # bf16 (f32 accumulation); observed error is O(1e-3) at these magnitudes.
    assert jnp.allclose(out, ref, atol=3e-2, rtol=3e-2), float(
        jnp.max(jnp.abs(out - ref))
    )

    print("KERNEL_OK")
</pallas_src>

<mosaic_0001>
module attributes {stable_mosaic.version = 11 : i64} {
  func.func @mlp_kernel(%arg0: i32, %arg1: memref<16x64xf32, #tpu.memory_space<vmem>>, %arg2: memref<64x128xbf16, #tpu.memory_space<vmem>>, %arg3: memref<1x128xf32, #tpu.memory_space<vmem>>, %arg4: memref<128x128xbf16, #tpu.memory_space<vmem>>, %arg5: memref<1x128xf32, #tpu.memory_space<vmem>>, %arg6: memref<128x69xbf16, #tpu.memory_space<vmem>>, %arg7: memref<1x69xf32, #tpu.memory_space<vmem>>, %arg8: memref<16x69xf32, #tpu.memory_space<vmem>>, %arg9: memref<16x128xf32, #tpu.memory_space<vmem>>) attributes {dimension_semantics = [#tpu.dimension_semantics<parallel>], iteration_bounds = array<i64: 1>, scalar_prefetch = 0 : i64, scratch_operands = 1 : i64, tpu.core_type = #tpu.core_type<tc>, window_params = [{transform_indices = @transform_0, window_bounds = array<i64: 16, 64>}, {pipeline_mode = #tpu.pipeline_mode<synchronous>, transform_indices = @transform_1, window_bounds = array<i64: 64, 128>}, {pipeline_mode = #tpu.pipeline_mode<synchronous>, transform_indices = @transform_2, window_bounds = array<i64: 1, 128>}, {pipeline_mode = #tpu.pipeline_mode<synchronous>, transform_indices = @transform_3, window_bounds = array<i64: 128, 128>}, {pipeline_mode = #tpu.pipeline_mode<synchronous>, transform_indices = @transform_4, window_bounds = array<i64: 1, 128>}, {pipeline_mode = #tpu.pipeline_mode<synchronous>, transform_indices = @transform_5, window_bounds = array<i64: 128, 69>}, {pipeline_mode = #tpu.pipeline_mode<synchronous>, transform_indices = @transform_6, window_bounds = array<i64: 1, 69>}, {transform_indices = @transform_7, window_bounds = array<i64: 16, 69>}]} {
    %c0 = arith.constant 0 : index
    %c0_0 = arith.constant 0 : index
    %0 = vector.load %arg1[%c0, %c0_0] : memref<16x64xf32, #tpu.memory_space<vmem>>, vector<16x64xf32>
    %1 = arith.truncf %0 : vector<16x64xf32> to vector<16x64xbf16>
    %c0_1 = arith.constant 0 : index
    %c0_2 = arith.constant 0 : index
    %2 = vector.load %arg2[%c0_1, %c0_2] : memref<64x128xbf16, #tpu.memory_space<vmem>>, vector<64x128xbf16>
    %cst = arith.constant dense<0.000000e+00> : vector<16x128xf32>
    %3 = tpu.matmul %1, %2, %cst {dimension_numbers = #tpu.dot_dimension_numbers<[1], [0], [0], [1], [0, 0, 1, 1], [], []>} : vector<16x64xbf16>, vector<64x128xbf16>, vector<16x128xf32> -> vector<16x128xf32>
    %c0_3 = arith.constant 0 : index
    %c0_4 = arith.constant 0 : index
    %4 = vector.load %arg3[%c0_3, %c0_4] : memref<1x128xf32, #tpu.memory_space<vmem>>, vector<1x128xf32>
    %5 = vector.broadcast %4 : vector<1x128xf32> to vector<16x128xf32>
    %6 = arith.addf %3, %5 : vector<16x128xf32>
    %cst_5 = arith.constant 0.000000e+00 : f32
    %7 = vector.broadcast %cst_5 : f32 to vector<16x128xf32>
    %8 = arith.maximumf %6, %7 : vector<16x128xf32>
    %c0_6 = arith.constant 0 : index
    %c0_7 = arith.constant 0 : index
    %9 = vector.load %arg9[%c0_6, %c0_7] : memref<16x128xf32, #tpu.memory_space<vmem>>, vector<16x128xf32>
    tpu.vector_store %arg9[%c0_6, %c0_7], %8 {strides = array<i32>} : memref<16x128xf32, #tpu.memory_space<vmem>>, vector<16x128xf32>,
    %c0_8 = arith.constant 0 : index
    %c0_9 = arith.constant 0 : index
    %10 = vector.load %arg9[%c0_8, %c0_9] : memref<16x128xf32, #tpu.memory_space<vmem>>, vector<16x128xf32>
    %11 = arith.truncf %10 : vector<16x128xf32> to vector<16x128xbf16>
    %c0_10 = arith.constant 0 : index
    %c0_11 = arith.constant 0 : index
    %12 = vector.load %arg4[%c0_10, %c0_11] : memref<128x128xbf16, #tpu.memory_space<vmem>>, vector<128x128xbf16>
    %cst_12 = arith.constant dense<0.000000e+00> : vector<16x128xf32>
    %13 = tpu.matmul %11, %12, %cst_12 {dimension_numbers = #tpu.dot_dimension_numbers<[1], [0], [0], [1], [0, 0, 1, 1], [], []>} : vector<16x128xbf16>, vector<128x128xbf16>, vector<16x128xf32> -> vector<16x128xf32>
    %c0_13 = arith.constant 0 : index
    %c0_14 = arith.constant 0 : index
    %14 = vector.load %arg5[%c0_13, %c0_14] : memref<1x128xf32, #tpu.memory_space<vmem>>, vector<1x128xf32>
    %15 = vector.broadcast %14 : vector<1x128xf32> to vector<16x128xf32>
    %16 = arith.addf %13, %15 : vector<16x128xf32>
    %cst_15 = arith.constant 0.000000e+00 : f32
    %17 = vector.broadcast %cst_15 : f32 to vector<16x128xf32>
    %18 = arith.maximumf %16, %17 : vector<16x128xf32>
    %c0_16 = arith.constant 0 : index
    %c0_17 = arith.constant 0 : index
    %19 = vector.load %arg9[%c0_16, %c0_17] : memref<16x128xf32, #tpu.memory_space<vmem>>, vector<16x128xf32>
    tpu.vector_store %arg9[%c0_16, %c0_17], %18 {strides = array<i32>} : memref<16x128xf32, #tpu.memory_space<vmem>>, vector<16x128xf32>,
    %c0_18 = arith.constant 0 : index
    %c0_19 = arith.constant 0 : index
    %20 = vector.load %arg9[%c0_18, %c0_19] : memref<16x128xf32, #tpu.memory_space<vmem>>, vector<16x128xf32>
    %21 = arith.truncf %20 : vector<16x128xf32> to vector<16x128xbf16>
    %c0_20 = arith.constant 0 : index
    %c0_21 = arith.constant 0 : index
    %22 = vector.load %arg6[%c0_20, %c0_21] : memref<128x69xbf16, #tpu.memory_space<vmem>>, vector<128x69xbf16>
    %cst_22 = arith.constant dense<0.000000e+00> : vector<16x69xf32>
    %23 = tpu.matmul %21, %22, %cst_22 {dimension_numbers = #tpu.dot_dimension_numbers<[1], [0], [0], [1], [0, 0, 1, 1], [], []>} : vector<16x128xbf16>, vector<128x69xbf16>, vector<16x69xf32> -> vector<16x69xf32>
    %c0_23 = arith.constant 0 : index
    %c0_24 = arith.constant 0 : index
    %24 = vector.load %arg7[%c0_23, %c0_24] : memref<1x69xf32, #tpu.memory_space<vmem>>, vector<1x69xf32>
    %25 = vector.broadcast %24 : vector<1x69xf32> to vector<16x69xf32>
    %26 = arith.addf %23, %25 : vector<16x69xf32>
    %c0_25 = arith.constant 0 : index
    %c0_26 = arith.constant 0 : index
    %27 = vector.load %arg8[%c0_25, %c0_26] : memref<16x69xf32, #tpu.memory_space<vmem>>, vector<16x69xf32>
    tpu.vector_store %arg8[%c0_25, %c0_26], %26 {strides = array<i32>} : memref<16x69xf32, #tpu.memory_space<vmem>>, vector<16x69xf32>,
    return
  }
  func.func @transform_0(%arg0: i32) -> (i32, i32) {
    %c0_i32 = arith.constant 0 : i32
    %c0_i32_0 = arith.constant 0 : i32
    return %arg0, %c0_i32 : i32, i32
  }
  func.func @transform_1(%arg0: i32) -> (i32, i32) {
    %c0_i32 = arith.constant 0 : i32
    %c0_i32_0 = arith.constant 0 : i32
    %c0_i32_1 = arith.constant 0 : i32
    return %c0_i32, %c0_i32_0 : i32, i32
  }
  func.func @transform_2(%arg0: i32) -> (i32, i32) {
    %c0_i32 = arith.constant 0 : i32
    %c0_i32_0 = arith.constant 0 : i32
    %c0_i32_1 = arith.constant 0 : i32
    return %c0_i32, %c0_i32_0 : i32, i32
  }
  func.func @transform_3(%arg0: i32) -> (i32, i32) {
    %c0_i32 = arith.constant 0 : i32
    %c0_i32_0 = arith.constant 0 : i32
    %c0_i32_1 = arith.constant 0 : i32
    return %c0_i32, %c0_i32_0 : i32, i32
  }
  func.func @transform_4(%arg0: i32) -> (i32, i32) {
    %c0_i32 = arith.constant 0 : i32
    %c0_i32_0 = arith.constant 0 : i32
    %c0_i32_1 = arith.constant 0 : i32
    return %c0_i32, %c0_i32_0 : i32, i32
  }
  func.func @transform_5(%arg0: i32) -> (i32, i32) {
    %c0_i32 = arith.constant 0 : i32
    %c0_i32_0 = arith.constant 0 : i32
    %c0_i32_1 = arith.constant 0 : i32
    return %c0_i32, %c0_i32_0 : i32, i32
  }
  func.func @transform_6(%arg0: i32) -> (i32, i32) {
    %c0_i32 = arith.constant 0 : i32
    %c0_i32_0 = arith.constant 0 : i32
    %c0_i32_1 = arith.constant 0 : i32
    return %c0_i32, %c0_i32_0 : i32, i32
  }
  func.func @transform_7(%arg0: i32) -> (i32, i32) {
    %c0_i32 = arith.constant 0 : i32
    %c0_i32_0 = arith.constant 0 : i32
    return %arg0, %c0_i32 : i32, i32
  }
}

</mosaic_0001>

<bundles_post_ra>
// kernel: ending_motion_generator_forward.1
= control target key start
LH: loop header
LB: loop body
LE: loop exit
PB: predicated region body
PF: predicated region fallthrough
CT: control target
= control target key end

     0   :  { %vm66_vm0 = vcmask 523264   ;;  %vm262_vm1 = vcmask 564224   ;;  %s494_s1 = inlined_call_operand.vmem [shape: bf16[64,128], index: 1, kind: input, shape index: {}]   ;;  %s495_s3 = inlined_call_operand.vmem [shape: bf16[128,128], index: 3, kind: input, shape index: {}]   ;;  %s496_s2 = inlined_call_operand.vmem [shape: f32[1,128], index: 2, kind: input, shape index: {}]   ;;  %s497_s0 = inlined_call_operand.vmem [shape: f32[16,64], index: 0, kind: input, shape index: {}]   ;;  %s498_s4 = inlined_call_operand.vmem [shape: f32[1,128], index: 4, kind: input, shape index: {}]   ;;  %s499_s5 = inlined_call_operand.vmem [shape: bf16[128,69], index: 5, kind: input, shape index: {}]   ;;  %s500_s6 = inlined_call_operand.vmem [shape: f32[1,69], index: 6, kind: input, shape index: {}]   ;;  %s501_s7 = inlined_call_operand.vmem [shape: f32[16,69], index: 7, kind: output, shape index: {}]  }
   0x1   :  { %v353_v0 = vld [vmem:[%s494_s1 + $0x18] sm:$0xff]  ;;  %v352_v1 = vld [vmem:[%s494_s1 + $0x10] sm:$0xff]  ;;  %v351_v4 = vld [vmem:[%s494_s1 + $0x8] sm:$0xff] }
   0x2   :  { %74 = vmatpush.bf16.msra.mxu0 %v353_v0  ;;  %v361_v2 = vld [vmem:[%s495_s3 + $0x38] sm:$0xff]  ;;  %v360_v3 = vld [vmem:[%s495_s3 + $0x30] sm:$0xff]  ;;  %v359_v5 = vld [vmem:[%s495_s3 + $0x28] sm:$0xff] }
   0x3   :  { %159 = vmatpush.bf16.msra.mxu1 %v361_v2  ;;  %v350_v6 = vld [vmem:[%s494_s1] sm:$0xff]  ;;  %v28_v8 = vld [vmem:[%s497_s0 + $0x8] sm:$0xff]  ;;  %v357_v11 = vld [vmem:[%s495_s3 + $0x18] sm:$0xff] }
   0x4   :  { %v27_v7 = vld [vmem:[%s497_s0] sm:$0xff]  ;;  %v356_v12 = vld [vmem:[%s495_s3 + $0x10] sm:$0xff]  ;;  %v355_v13 = vld [vmem:[%s495_s3 + $0x8] sm:$0xff] }
   0x5   :  { %v358_v9 = vld [vmem:[%s495_s3 + $0x20] sm:$0xff]  ;;  %v29_v10 = vpack.c.bf16 %v28_v8, %v27_v7  ;;  %v369_v15 = vld [vmem:[%s499_s5 + $0x38] sm:$0xff]  ;;  %v368_v16 = vld [vmem:[%s499_s5 + $0x30] sm:$0xff] }
   0x6   :  { %75 = vmatpush.bf16.msra.mxu0 %v352_v1  ;;  %v354_v14 = vld [vmem:[%s495_s3] sm:$0xff]  ;;  %248 = vmatpush.bf16.msra.mxu2 %v369_v15  ;;  %v367_v17 = vld [vmem:[%s499_s5 + $0x28] sm:$0xff]  ;;  %v365_v27 = vld [vmem:[%s499_s5 + $0x18] sm:$0xff] }
   0x7   :  { %160 = vmatpush.bf16.msra.mxu1 %v360_v3  ;;  %v366_v18 = vld [vmem:[%s499_s5 + $0x20] sm:$0xff]  ;;  %v364_v28 = vld [vmem:[%s499_s5 + $0x10] sm:$0xff]  ;;  %v363_v29 = vld [vmem:[%s499_s5 + $0x8] sm:$0xff] }
   0x8   :  { %v370_v20 = vld [vmem:[%s496_s2] ss:$0 sm:$0xff] }
   0x9   :  { %v362_v30 = vld [vmem:[%s499_s5] sm:$0xff] }
   0xa   :  { %76 = vmatpush.bf16.msra.mxu0 %v351_v4  ;;  %249 = vmatpush.bf16.msra.mxu2 %v368_v16  ;;  %v371_v32 = vld [vmem:[%s498_s4] ss:$0 sm:$0xff] }
   0xb   :  { %161 = vmatpush.bf16.msra.mxu1 %v359_v5  ;;  %v372_v39 = vld [vmem:[%s500_s6] ss:$0 sm:$0xff] }
   0xe   :  { %77 = vmatpush.bf16.msra.mxu0 %v350_v6  ;;  %250 = vmatpush.bf16.msra.mxu2 %v367_v17 }
   0xf   :  { %162 = vmatpush.bf16.msra.mxu1 %v358_v9 }
  0x11   :  { %285 = vmatmul.msk.bf16.vlgmr.msra.gmra.mxu0 %vm66_vm0, %v29_v10 }
  0x12   :  { %251 = vmatpush.bf16.msra.mxu2 %v366_v18 }
  0x13   :  { %163 = vmatpush.bf16.msra.mxu1 %v357_v11 }
  0x16   :  { %252 = vmatpush.bf16.msra.mxu2 %v365_v27 }
  0x17   :  { %164 = vmatpush.bf16.msra.mxu1 %v356_v12 }
  0x1a   :  { %253 = vmatpush.bf16.msra.mxu2 %v364_v28 }
  0x1b   :  { %165 = vmatpush.bf16.msra.mxu1 %v355_v13 }
  0x1e   :  { %254 = vmatpush.bf16.msra.mxu2 %v363_v29 }
  0x1f   :  { %166 = vmatpush.bf16.msra.mxu1 %v354_v14 }
  0x22   :  { %255 = vmatpush.bf16.msra.mxu2 %v362_v30 }
  0x8e   :  { %v79_v19 = vpop.f32.mrf.mxu0 }
  0x8f   :  { %v80_v21 = vadd.f32 %v370_v20, %v79_v19 }
  0x91   :  { %v84_v24 = vmax.f32 %v80_v21, 0.0 }
  0x96   :  { %v81_v22 = vpop.f32.mrf.mxu0 }
  0x97   :  { %v82_v23 = vadd.f32 %v370_v20, %v81_v22 }
  0x99   :  { %v85_v25 = vmax.f32 %v82_v23, 0.0 }
  0x9b   :  { %v90_v26 = vpack.c.bf16 %v85_v25, %v84_v24 }
  0x9d   :  { %167 = vmatmul.bf16.vlgmr.msra.gmra.mxu1 %v90_v26 }
 0x11a   :  { %v168_v31 = vpop.f32.mrf.mxu1 }
 0x11b   :  { %v169_v33 = vadd.f32 %v371_v32, %v168_v31 }
 0x11d   :  { %v173_v36 = vmax.f32 %v169_v33, 0.0 }
 0x122   :  { %v170_v34 = vpop.f32.mrf.mxu1 }
 0x123   :  { %v171_v35 = vadd.f32 %v371_v32, %v170_v34 }
 0x125   :  { %v174_v37 = vmax.f32 %v171_v35, 0.0 }
 0x127   :  { %v179_v38 = vpack.c.bf16 %v174_v37, %v173_v36 }
 0x129   :  { %256 = vmatmul.bf16.vlgmr.msra.gmra.mxu2 %v179_v38 }
 0x1ac   :  { %v257_v40 = vpop.f32.mrf.mxu2 }
 0x1ad   :  { %v258_v41 = vadd.f32 %v372_v39, %v257_v40 }
 0x1af   :  { %263 = vst.msk [vmem:[%s501_s7] sm:$0xff] %vm262_vm1, %v258_v41 }
 0x1b4   :  { %v259_v42 = vpop.f32.mrf.mxu2 }
 0x1b5   :  { %v260_v43 = vadd.f32 %v372_v39, %v259_v42 }
 0x1b7   :  { %264 = vst.msk [vmem:[%s501_s7 + $0x8] sm:$0xff] %vm262_vm1, %v260_v43 }

</bundles_post_ra>
